<compile_context>
chip_gen: v7x
topology: tpu7x:2x2x1
jax: 0.10.0
libtpu: 0.0.40
codegen_flags: <defaults>
</compile_context>

<pallas_src>
import functools

import jax
import jax.numpy as jnp
from jax import lax
from jax.experimental import pallas as pl
from jax.experimental.pallas import tpu as pltpu

HIDDEN_SIZE = 32        # hidden_size
NODE_OUTPUT_SIZE = 16   # node_output_size (decoder vocab, incl. SOS/EOS)
VOCAB_PAD = 128         # vocab padded to one full lane register (lane-dense stores)
NEG_INF = -1e30         # pad-column bias: exp() underflows to 0 -> log_softmax exact


def _decode_kernel(tok_ref, hc_ref, emb_ref, w_ref, b_ref,
                   logp_ref, tok_out_ref, hc_out_ref):
    """Fused greedy decoder: n_steps x (ReLU(emb) -> LSTM cell -> Linear -> log_softmax).

    Batched over the sublane (M) dimension; weights stay resident in VMEM and are
    read once before the unrolled step loop.  The greedy argmax feedback
    (torch .topk(1)) is done in-kernel: lane-min index select + one-hot MXU gather.
    """
    H = hc_ref.shape[-1]
    V = emb_ref.shape[0]
    n_steps = logp_ref.shape[0]
    VP = logp_ref.shape[-1]
    bb = hc_ref.shape[1]

    # lane-index helpers (TPU needs >=2-D iotas)
    col_v_i = lax.broadcasted_iota(jnp.int32, (1, V), 1)                    # token ids
    col_v_f = col_v_i.astype(jnp.float32)
    col_vp_i = lax.broadcasted_iota(jnp.int32, (1, VP), 1)
    col_vp_f = col_vp_i.astype(jnp.float32)

    # hoisted weight / bias reads — resident for the whole decode
    w_ih = w_ref[0:H, :]             # (H, 4H) bf16
    w_hh = w_ref[H:2 * H, :]         # (H, 4H) bf16
    w_out = w_ref[2 * H:3 * H, :]    # (H, VP) bf16 (pad columns are zero)
    b_gates = b_ref[0:1, :]          # (1, 4H) f32   (b_ih + b_hh pre-summed)
    b_out = b_ref[1:2, :]            # (1, VP) f32   (pad lanes = -1e30, kept f32)
    emb = emb_ref[...]               # (V, H)  f32   (exact embedding rows)

    def embed_onehot(onehot_f32):
        # (bb, V) one-hot @ (V, H) table: row gather on the (otherwise idle) MXU,
        # keeping the XLU sublane-reduce off the recurrence critical path.
        return jnp.dot(onehot_f32, emb, preferred_element_type=jnp.float32)

    x = embed_onehot((col_v_i == tok_ref[...]).astype(jnp.float32))          # (bb, H)
    h = hc_ref[0]                                                            # (bb, H)
    c = hc_ref[1]                                                            # (bb, H)

    tok_acc = jnp.zeros((bb, VP), jnp.float32)   # greedy tokens, lane s = step s

    # n_steps is a trace-time constant and small (<=16) here, so full unroll.
    # TODO(synk): for long decodes switch to lax.fori_loop(unroll=4) with the
    # carries in VMEM scratch to bound vreg live ranges.
    for s in range(n_steps):
        xb = jnp.maximum(x, 0.0).astype(jnp.bfloat16)     # ReLU(embedding)
        hb = h.astype(jnp.bfloat16)
        # two register-resident dots (no VMEM staging of an [x;h] row)
        gates = (jnp.dot(xb, w_ih, preferred_element_type=jnp.float32)
                 + jnp.dot(hb, w_hh, preferred_element_type=jnp.float32)
                 + b_gates)                                                  # (bb, 4H)

        # PyTorch LSTM gate order: input, forget, cell(g), output
        i_g = jax.nn.sigmoid(gates[:, 0 * H:1 * H])
        f_g = jax.nn.sigmoid(gates[:, 1 * H:2 * H])
        g_g = jnp.tanh(gates[:, 2 * H:3 * H])
        o_g = jax.nn.sigmoid(gates[:, 3 * H:4 * H])

        c = f_g * c + i_g * g_g
        h = o_g * jnp.tanh(c)

        # output projection (vocab padded to VP lanes) + log_softmax
        logits = (jnp.dot(h.astype(jnp.bfloat16), w_out,
                          preferred_element_type=jnp.float32) + b_out)       # (bb, VP)
        m = jnp.max(logits, axis=-1, keepdims=True)
        lse = m + jnp.log(jnp.sum(jnp.exp(logits - m), axis=-1, keepdims=True))
        logp_ref[s] = logits - lse        # dense (bb, 128) store per step

        if n_steps > 1:
            # greedy feedback (== torch .topk(1)); ties break to the LOWEST index
            # (torch's tie order is unspecified, so this may differ on exact ties).
            sel_f = jnp.min(jnp.where(logits >= m, col_vp_f, float(VP)),
                            axis=-1, keepdims=True)                          # (bb, 1)
            tok_acc = jnp.where(col_vp_i == s, sel_f, tok_acc)   # lane select, no store
            if s + 1 < n_steps:
                x = embed_onehot((col_v_f == sel_f).astype(jnp.float32))

    tok_out_ref[...] = tok_acc.astype(jnp.int32)   # single lane-dense store
    hc_out_ref[0] = h
    hc_out_ref[1] = c


def _decode_pallas(params, tok0, hc_in, n_steps):
    emb = params["emb"]        # (V, H)   f32
    w_all = params["w_all"]    # (3H, VP) bf16
    b_all = params["b_all"]    # (2, VP)  f32
    V, H = emb.shape
    VP = w_all.shape[-1]
    B = hc_in.shape[1]

    bb = min(B, 8)             # fill f32 sublanes; >1 block => grid splits batch
    assert B % bb == 0
    nb = B // bb

    cost = pl.CostEstimate(
        flops=B * n_steps * 2 * (V * H + 2 * H * 4 * H + H * VP),
        transcendentals=B * n_steps * (5 * H + VP + 1),
        bytes_accessed=(4 * (emb.size + b_all.size + 4 * B * H
                             + B * n_steps * (VP + 1))
                        + 2 * w_all.size),
    )

    return pl.pallas_call(
        _decode_kernel,
        out_shape=(
            jax.ShapeDtypeStruct((n_steps, B, VP), jnp.float32),  # padded log-probs
            jax.ShapeDtypeStruct((B, VP), jnp.int32),             # greedy token per lane=step
            jax.ShapeDtypeStruct((2, B, H), jnp.float32),         # final [h; c]
        ),
        grid=(nb,),
        in_specs=[
            pl.BlockSpec((bb, 1), lambda i: (i, 0)),              # start tokens (column)
            pl.BlockSpec((2, bb, H), lambda i: (0, i, 0)),        # [h0; c0]
            pl.BlockSpec((V, H), lambda i: (0, 0)),               # embedding table
            pl.BlockSpec(w_all.shape, lambda i: (0, 0)),          # [W_ih^T;W_hh^T;W_out^T]
            pl.BlockSpec(b_all.shape, lambda i: (0, 0)),          # [b_ih+b_hh ; b_out pad]
        ],
        out_specs=(
            pl.BlockSpec((n_steps, bb, VP), lambda i: (0, i, 0)),
            pl.BlockSpec((bb, VP), lambda i: (i, 0)),
            pl.BlockSpec((2, bb, H), lambda i: (0, i, 0)),
        ),
        input_output_aliases={1: 2},                              # hc buffer reused
        compiler_params=pltpu.CompilerParams(
            dimension_semantics=("parallel",)),                   # v7x: both TCs
        cost_estimate=cost,
    )(tok0, hc_in, emb, w_all, b_all)


@jax.jit
def policy_forward(params, token, hidden):
    """Mirrors Policy.forward(input, hidden): one decoder step (B=1).

    token  : int array of shape (1, 1), e.g. [[SOS_token]]
    hidden : tuple (h, c), each float32 (1, 1, H)
    returns (log_probs (1, V), (h', c') each (1, 1, H))
    """
    h0, c0 = hidden
    H = h0.shape[-1]
    V = params["emb"].shape[0]
    hc_in = jnp.stack([h0.reshape(1, H), c0.reshape(1, H)], axis=0)   # (2, 1, H)
    tok0 = token.reshape((1, 1)).astype(jnp.int32)
    logp, _toks, hc_out = _decode_pallas(params, tok0, hc_in, n_steps=1)
    log_probs = logp[0, :, :V]                                        # drop lane padding
    return log_probs, (hc_out[0].reshape(1, 1, H), hc_out[1].reshape(1, 1, H))


@functools.partial(jax.jit, static_argnames=("max_length",))
def greedy_decode(params, start_tokens, g_embeddings, max_length):
    """generate_node_baseline's hot loop, batched over B independent graphs and
    fused into ONE pallas_call (batch fills the MXU M rows / both v7x cores)."""
    V, H = params["emb"].shape
    B = start_tokens.shape[0]
    h0 = g_embeddings.reshape(B, H)
    hc_in = jnp.stack([h0, jnp.zeros_like(h0)], axis=0)               # (2, B, H)
    tok0 = start_tokens.reshape(B, 1).astype(jnp.int32)
    logp, toks, hc_out = _decode_pallas(params, tok0, hc_in, n_steps=max_length)
    # TODO(synk): the `break` on EOS_token in generate_node_baseline is host-side
    # control flow; the kernel always runs max_length steps and the caller trims.
    return (jnp.transpose(logp[:, :, :V], (1, 0, 2)),                 # (B, L, V)
            toks[:, :max_length],                                     # (B, L)
            hc_out)                                                   # (2, B, H)


def init_raw_params(key, hidden_size=HIDDEN_SIZE, vocab=NODE_OUTPUT_SIZE):
    """PyTorch-layout parameters of Embedding(V,H) -> LSTM(H,H) -> Linear(H,V)."""
    ks = jax.random.split(key, 7)
    s = hidden_size ** -0.5
    u = lambda k, shape: jax.random.uniform(k, shape, jnp.float32, -s, s)
    return {
        "embedding": jax.random.normal(ks[0], (vocab, hidden_size), jnp.float32),
        "w_ih": u(ks[1], (4 * hidden_size, hidden_size)),
        "w_hh": u(ks[2], (4 * hidden_size, hidden_size)),
        "b_ih": u(ks[3], (4 * hidden_size,)),
        "b_hh": u(ks[4], (4 * hidden_size,)),
        "w_out": u(ks[5], (vocab, hidden_size)),
        "b_out": u(ks[6], (vocab,)),
    }


def pack_params(raw):
    """Fuse/pad the PyTorch-layout weights into the kernel's VMEM-resident layout."""
    V, H = raw["embedding"].shape
    VP = VOCAB_PAD
    # layout assumes 4*H == VP == 128 so both slabs are exactly 128 lanes wide
    assert 4 * H == VP, "kernel layout assumes 4*hidden == padded vocab == 128"
    w_out_p = jnp.zeros((H, VP), jnp.float32).at[:, :V].set(raw["w_out"].T)    # (H, VP)
    w_all = jnp.concatenate([raw["w_ih"].T, raw["w_hh"].T, w_out_p], axis=0)   # (3H, 128)
    b_gates = (raw["b_ih"] + raw["b_hh"]).reshape(1, 4 * H)
    b_out_p = jnp.full((1, VP), NEG_INF, jnp.float32).at[0, :V].set(raw["b_out"])
    b_all = jnp.concatenate([b_gates, b_out_p], axis=0).astype(jnp.float32)    # (2, 128)
    return {"emb": raw["embedding"].astype(jnp.float32),       # gather stays exact f32
            "w_all": w_all.astype(jnp.bfloat16),               # MXU-native operands
            "b_all": b_all}                                    # f32 (keeps -1e30 pad)


def reference_forward(raw, token, hidden):
    """Pure-JAX mirror of the PyTorch decoder step (for validation only)."""
    H = raw["w_ih"].shape[1]
    h = hidden[0].reshape(H)
    c = hidden[1].reshape(H)
    x = jnp.maximum(raw["embedding"][token.reshape(())], 0.0)
    gates = raw["w_ih"] @ x + raw["w_hh"] @ h + raw["b_ih"] + raw["b_hh"]
    i_g = jax.nn.sigmoid(gates[0 * H:1 * H])
    f_g = jax.nn.sigmoid(gates[1 * H:2 * H])
    g_g = jnp.tanh(gates[2 * H:3 * H])
    o_g = jax.nn.sigmoid(gates[3 * H:4 * H])
    c_new = f_g * c + i_g * g_g
    h_new = o_g * jnp.tanh(c_new)
    logits = raw["w_out"] @ h_new + raw["b_out"]
    logp = jax.nn.log_softmax(logits)
    return logp.reshape(1, -1), (h_new.reshape(1, 1, H), c_new.reshape(1, 1, H))


if __name__ == "__main__":
    key = jax.random.PRNGKey(0)
    pkey, hkey, bkey = jax.random.split(key, 3)

    raw = init_raw_params(pkey)
    params = pack_params(raw)

    SOS_token = 1
    token = jnp.array([[SOS_token]], dtype=jnp.int32)                    # (1, 1)
    g_embedding = jax.random.normal(hkey, (1, 1, HIDDEN_SIZE), jnp.float32)
    hidden = (g_embedding, jnp.zeros_like(g_embedding))                  # (h0, c0)

    # --- Policy.forward: one decoder step through the fused kernel --------------
    log_probs, (h_new, c_new) = policy_forward(params, token, hidden)
    jax.block_until_ready((log_probs, h_new, c_new))

    assert log_probs.shape == (1, NODE_OUTPUT_SIZE)
    assert h_new.shape == (1, 1, HIDDEN_SIZE) and c_new.shape == (1, 1, HIDDEN_SIZE)
    assert abs(float(jnp.sum(jnp.exp(log_probs))) - 1.0) < 1e-3

    ref_lp, (ref_h, ref_c) = reference_forward(raw, token, hidden)
    assert jnp.allclose(log_probs, ref_lp, atol=5e-2), "log_probs mismatch vs reference"
    assert jnp.allclose(h_new, ref_h, atol=5e-2)
    assert jnp.allclose(c_new, ref_c, atol=5e-2)

    # --- generate_node_baseline hot loop: batched greedy decode in ONE launch ---
    MAX_LENGTH = 8
    B = 16
    g_batch = jax.random.normal(bkey, (B, HIDDEN_SIZE), jnp.float32)
    g_batch = g_batch.at[0].set(g_embedding.reshape(HIDDEN_SIZE))   # row 0 == single case
    start_toks = jnp.full((B,), SOS_token, dtype=jnp.int32)

    logp_seq, toks, hc_final = greedy_decode(params, start_toks, g_batch,
                                             max_length=MAX_LENGTH)
    jax.block_until_ready((logp_seq, toks, hc_final))

    assert logp_seq.shape == (B, MAX_LENGTH, NODE_OUTPUT_SIZE)
    assert toks.shape == (B, MAX_LENGTH)
    assert hc_final.shape == (2, B, HIDDEN_SIZE)
    # step 0 of batch row 0 of the fused decode is exactly Policy.forward above
    assert jnp.allclose(logp_seq[0, 0:1], log_probs, atol=1e-3)
    # the kernel's greedy choice agrees with argmax of its own log-probs
    assert int(toks[0, 0]) == int(jnp.argmax(logp_seq[0, 0]))

    print("KERNEL_OK")
</pallas_src>

<mosaic_0001>
module attributes {stable_mosaic.version = 11 : i64} {
  func.func @_decode_kernel(%arg0: i32, %arg1: memref<1x1xi32, #tpu.memory_space<vmem>>, %arg2: memref<2x1x32xf32, #tpu.memory_space<vmem>>, %arg3: memref<16x32xf32, #tpu.memory_space<vmem>>, %arg4: memref<96x128xbf16, #tpu.memory_space<vmem>>, %arg5: memref<2x128xf32, #tpu.memory_space<vmem>>, %arg6: memref<1x1x128xf32, #tpu.memory_space<vmem>>, %arg7: memref<1x128xi32, #tpu.memory_space<vmem>>, %arg8: memref<2x1x32xf32, #tpu.memory_space<vmem>>) attributes {dimension_semantics = [#tpu.dimension_semantics<parallel>], iteration_bounds = array<i64: 1>, scalar_prefetch = 0 : i64, scratch_operands = 0 : i64, tpu.core_type = #tpu.core_type<tc>, window_params = [{transform_indices = @transform_0, window_bounds = array<i64: 1, 1>}, {transform_indices = @transform_1, window_bounds = array<i64: 2, 1, 32>}, {pipeline_mode = #tpu.pipeline_mode<synchronous>, transform_indices = @transform_2, window_bounds = array<i64: 16, 32>}, {pipeline_mode = #tpu.pipeline_mode<synchronous>, transform_indices = @transform_3, window_bounds = array<i64: 96, 128>}, {pipeline_mode = #tpu.pipeline_mode<synchronous>, transform_indices = @transform_4, window_bounds = array<i64: 2, 128>}, {transform_indices = @transform_5, window_bounds = array<i64: 1, 1, 128>}, {transform_indices = @transform_6, window_bounds = array<i64: 1, 128>}, {transform_indices = @transform_7, window_bounds = array<i64: 2, 1, 32>}]} {
    %0 = tpu.iota {dimensions = array<i32: 1>} : vector<1x16xi32>
    %c0 = arith.constant 0 : index
    %c0_0 = arith.constant 0 : index
    %1 = vector.load %arg4[%c0, %c0_0] : memref<96x128xbf16, #tpu.memory_space<vmem>>, vector<32x128xbf16>
    %c32 = arith.constant 32 : index
    %c0_1 = arith.constant 0 : index
    %2 = vector.load %arg4[%c32, %c0_1] : memref<96x128xbf16, #tpu.memory_space<vmem>>, vector<32x128xbf16>
    %c64 = arith.constant 64 : index
    %c0_2 = arith.constant 0 : index
    %3 = vector.load %arg4[%c64, %c0_2] : memref<96x128xbf16, #tpu.memory_space<vmem>>, vector<32x128xbf16>
    %c0_3 = arith.constant 0 : index
    %c0_4 = arith.constant 0 : index
    %4 = vector.load %arg5[%c0_3, %c0_4] : memref<2x128xf32, #tpu.memory_space<vmem>>, vector<1x128xf32>
    %c1 = arith.constant 1 : index
    %c0_5 = arith.constant 0 : index
    %5 = vector.load %arg5[%c1, %c0_5] : memref<2x128xf32, #tpu.memory_space<vmem>>, vector<1x128xf32>
    %c0_6 = arith.constant 0 : index
    %c0_7 = arith.constant 0 : index
    %6 = vector.load %arg3[%c0_6, %c0_7] : memref<16x32xf32, #tpu.memory_space<vmem>>, vector<16x32xf32>
    %c0_8 = arith.constant 0 : index
    %c0_9 = arith.constant 0 : index
    %7 = vector.load %arg1[%c0_8, %c0_9] : memref<1x1xi32, #tpu.memory_space<vmem>>, vector<1x1xi32>
    %8 = vector.broadcast %7 : vector<1x1xi32> to vector<1x16xi32>
    %9 = arith.cmpi eq, %0, %8 : vector<1x16xi32>
    %10 = arith.extui %9 : vector<1x16xi1> to vector<1x16xi32>
    %11 = arith.sitofp %10 : vector<1x16xi32> to vector<1x16xf32>
    %cst = arith.constant dense<0.000000e+00> : vector<1x32xf32>
    %12 = tpu.matmul %11, %6, %cst {dimension_numbers = #tpu.dot_dimension_numbers<[1], [0], [0], [1], [0, 0, 1, 1], [], []>} : vector<1x16xf32>, vector<16x32xf32>, vector<1x32xf32> -> vector<1x32xf32>
    %c0_10 = arith.constant 0 : index
    %c0_11 = arith.constant 0 : index
    %c0_12 = arith.constant 0 : index
    %13 = vector.load %arg2[%c0_10, %c0_11, %c0_12] : memref<2x1x32xf32, #tpu.memory_space<vmem>>, vector<1x1x32xf32>
    %14 = vector.shape_cast %13 : vector<1x1x32xf32> to vector<1x32xf32>
    %c1_13 = arith.constant 1 : index
    %c0_14 = arith.constant 0 : index
    %c0_15 = arith.constant 0 : index
    %15 = vector.load %arg2[%c1_13, %c0_14, %c0_15] : memref<2x1x32xf32, #tpu.memory_space<vmem>>, vector<1x1x32xf32>
    %16 = vector.shape_cast %15 : vector<1x1x32xf32> to vector<1x32xf32>
    %cst_16 = arith.constant 0.000000e+00 : f32
    %17 = vector.broadcast %cst_16 : f32 to vector<1x128xf32>
    %cst_17 = arith.constant 0.000000e+00 : f32
    %18 = vector.broadcast %cst_17 : f32 to vector<1x32xf32>
    %19 = arith.maximumf %12, %18 : vector<1x32xf32>
    %20 = arith.truncf %19 : vector<1x32xf32> to vector<1x32xbf16>
    %21 = arith.truncf %14 : vector<1x32xf32> to vector<1x32xbf16>
    %cst_18 = arith.constant dense<0.000000e+00> : vector<1x128xf32>
    %22 = tpu.matmul %20, %1, %cst_18 {dimension_numbers = #tpu.dot_dimension_numbers<[1], [0], [0], [1], [0, 0, 1, 1], [], []>} : vector<1x32xbf16>, vector<32x128xbf16>, vector<1x128xf32> -> vector<1x128xf32>
    %cst_19 = arith.constant dense<0.000000e+00> : vector<1x128xf32>
    %23 = tpu.matmul %21, %2, %cst_19 {dimension_numbers = #tpu.dot_dimension_numbers<[1], [0], [0], [1], [0, 0, 1, 1], [], []>} : vector<1x32xbf16>, vector<32x128xbf16>, vector<1x128xf32> -> vector<1x128xf32>
    %24 = arith.addf %22, %23 : vector<1x128xf32>
    %25 = arith.addf %24, %4 : vector<1x128xf32>
    %26 = vector.extract_strided_slice %25 {offsets = [0, 0], sizes = [1, 32], strides = [1, 1]} : vector<1x128xf32> to vector<1x32xf32>
    %27 = arith.negf %26 : vector<1x32xf32>
    %28 = math.exp %27 : vector<1x32xf32>
    %cst_20 = arith.constant 1.000000e+00 : f32
    %29 = vector.broadcast %cst_20 : f32 to vector<1x32xf32>
    %30 = arith.addf %29, %28 : vector<1x32xf32>
    %31 = arith.divf %29, %30 : vector<1x32xf32>
    %32 = vector.extract_strided_slice %25 {offsets = [0, 32], sizes = [1, 32], strides = [1, 1]} : vector<1x128xf32> to vector<1x32xf32>
    %33 = arith.negf %32 : vector<1x32xf32>
    %34 = math.exp %33 : vector<1x32xf32>
    %cst_21 = arith.constant 1.000000e+00 : f32
    %35 = vector.broadcast %cst_21 : f32 to vector<1x32xf32>
    %36 = arith.addf %35, %34 : vector<1x32xf32>
    %37 = arith.divf %35, %36 : vector<1x32xf32>
    %38 = vector.extract_strided_slice %25 {offsets = [0, 64], sizes = [1, 32], strides = [1, 1]} : vector<1x128xf32> to vector<1x32xf32>
    %39 = math.tanh %38 : vector<1x32xf32>
    %40 = vector.extract_strided_slice %25 {offsets = [0, 96], sizes = [1, 32], strides = [1, 1]} : vector<1x128xf32> to vector<1x32xf32>
    %41 = arith.negf %40 : vector<1x32xf32>
    %42 = math.exp %41 : vector<1x32xf32>
    %cst_22 = arith.constant 1.000000e+00 : f32
    %43 = vector.broadcast %cst_22 : f32 to vector<1x32xf32>
    %44 = arith.addf %43, %42 : vector<1x32xf32>
    %45 = arith.divf %43, %44 : vector<1x32xf32>
    %46 = arith.mulf %37, %16 : vector<1x32xf32>
    %47 = arith.mulf %31, %39 : vector<1x32xf32>
    %48 = arith.addf %46, %47 : vector<1x32xf32>
    %49 = math.tanh %48 : vector<1x32xf32>
    %50 = arith.mulf %45, %49 : vector<1x32xf32>
    %51 = arith.truncf %50 : vector<1x32xf32> to vector<1x32xbf16>
    %cst_23 = arith.constant dense<0.000000e+00> : vector<1x128xf32>
    %52 = tpu.matmul %51, %3, %cst_23 {dimension_numbers = #tpu.dot_dimension_numbers<[1], [0], [0], [1], [0, 0, 1, 1], [], []>} : vector<1x32xbf16>, vector<32x128xbf16>, vector<1x128xf32> -> vector<1x128xf32>
    %53 = arith.addf %52, %5 : vector<1x128xf32>
    %cst_24 = arith.constant dense<0xFF800000> : vector<1xf32>
    %54 = vector.multi_reduction <maximumf>, %53, %cst_24 [1] : vector<1x128xf32> to vector<1xf32>
    %55 = vector.shape_cast %54 : vector<1xf32> to vector<1x1xf32>
    %56 = vector.broadcast %55 : vector<1x1xf32> to vector<1x128xf32>
    %57 = arith.subf %53, %56 : vector<1x128xf32>
    %58 = math.exp %57 : vector<1x128xf32>
    %cst_25 = arith.constant dense<0.000000e+00> : vector<1xf32>
    %59 = vector.multi_reduction <add>, %58, %cst_25 [1] : vector<1x128xf32> to vector<1xf32>
    %60 = vector.shape_cast %59 : vector<1xf32> to vector<1x1xf32>
    %61 = math.log %60 : vector<1x1xf32>
    %62 = arith.addf %55, %61 : vector<1x1xf32>
    %63 = vector.broadcast %62 : vector<1x1xf32> to vector<1x128xf32>
    %64 = arith.subf %53, %63 : vector<1x128xf32>
    %c0_26 = arith.constant 0 : index
    %c0_27 = arith.constant 0 : index
    %c0_28 = arith.constant 0 : index
    %65 = vector.load %arg6[%c0_26, %c0_27, %c0_28] : memref<1x1x128xf32, #tpu.memory_space<vmem>>, vector<1x1x128xf32>
    %66 = vector.shape_cast %65 : vector<1x1x128xf32> to vector<1x128xf32>
    %67 = vector.shape_cast %64 : vector<1x128xf32> to vector<1x1x128xf32>
    tpu.vector_store %arg6[%c0_26, %c0_27, %c0_28], %67 {strides = array<i32>} : memref<1x1x128xf32, #tpu.memory_space<vmem>>, vector<1x1x128xf32>,
    %68 = arith.fptosi %17 : vector<1x128xf32> to vector<1x128xi32>
    %c0_29 = arith.constant 0 : index
    %c0_30 = arith.constant 0 : index
    %69 = vector.load %arg7[%c0_29, %c0_30] : memref<1x128xi32, #tpu.memory_space<vmem>>, vector<1x128xi32>
    tpu.vector_store %arg7[%c0_29, %c0_30], %68 {strides = array<i32>} : memref<1x128xi32, #tpu.memory_space<vmem>>, vector<1x128xi32>,
    %c0_31 = arith.constant 0 : index
    %c0_32 = arith.constant 0 : index
    %c0_33 = arith.constant 0 : index
    %70 = vector.load %arg8[%c0_31, %c0_32, %c0_33] : memref<2x1x32xf32, #tpu.memory_space<vmem>>, vector<1x1x32xf32>
    %71 = vector.shape_cast %70 : vector<1x1x32xf32> to vector<1x32xf32>
    %72 = vector.shape_cast %50 : vector<1x32xf32> to vector<1x1x32xf32>
    tpu.vector_store %arg8[%c0_31, %c0_32, %c0_33], %72 {strides = array<i32>} : memref<2x1x32xf32, #tpu.memory_space<vmem>>, vector<1x1x32xf32>,
    %c1_34 = arith.constant 1 : index
    %c0_35 = arith.constant 0 : index
    %c0_36 = arith.constant 0 : index
    %73 = vector.load %arg8[%c1_34, %c0_35, %c0_36] : memref<2x1x32xf32, #tpu.memory_space<vmem>>, vector<1x1x32xf32>
    %74 = vector.shape_cast %73 : vector<1x1x32xf32> to vector<1x32xf32>
    %75 = vector.shape_cast %48 : vector<1x32xf32> to vector<1x1x32xf32>
    tpu.vector_store %arg8[%c1_34, %c0_35, %c0_36], %75 {strides = array<i32>} : memref<2x1x32xf32, #tpu.memory_space<vmem>>, vector<1x1x32xf32>,
    return
  }
  func.func @transform_0(%arg0: i32) -> (i32, i32) {
    %c0_i32 = arith.constant 0 : i32
    %c0_i32_0 = arith.constant 0 : i32
    return %arg0, %c0_i32 : i32, i32
  }
  func.func @transform_1(%arg0: i32) -> (i32, i32, i32) {
    %c0_i32 = arith.constant 0 : i32
    %c0_i32_0 = arith.constant 0 : i32
    %c0_i32_1 = arith.constant 0 : i32
    return %c0_i32, %arg0, %c0_i32_0 : i32, i32, i32
  }
  func.func @transform_2(%arg0: i32) -> (i32, i32) {
    %c0_i32 = arith.constant 0 : i32
    %c0_i32_0 = arith.constant 0 : i32
    %c0_i32_1 = arith.constant 0 : i32
    return %c0_i32, %c0_i32_0 : i32, i32
  }
  func.func @transform_3(%arg0: i32) -> (i32, i32) {
    %c0_i32 = arith.constant 0 : i32
    %c0_i32_0 = arith.constant 0 : i32
    %c0_i32_1 = arith.constant 0 : i32
    return %c0_i32, %c0_i32_0 : i32, i32
  }
  func.func @transform_4(%arg0: i32) -> (i32, i32) {
    %c0_i32 = arith.constant 0 : i32
    %c0_i32_0 = arith.constant 0 : i32
    %c0_i32_1 = arith.constant 0 : i32
    return %c0_i32, %c0_i32_0 : i32, i32
  }
  func.func @transform_5(%arg0: i32) -> (i32, i32, i32) {
    %c0_i32 = arith.constant 0 : i32
    %c0_i32_0 = arith.constant 0 : i32
    %c0_i32_1 = arith.constant 0 : i32
    return %c0_i32, %arg0, %c0_i32_0 : i32, i32, i32
  }
  func.func @transform_6(%arg0: i32) -> (i32, i32) {
    %c0_i32 = arith.constant 0 : i32
    %c0_i32_0 = arith.constant 0 : i32
    return %arg0, %c0_i32 : i32, i32
  }
  func.func @transform_7(%arg0: i32) -> (i32, i32, i32) {
    %c0_i32 = arith.constant 0 : i32
    %c0_i32_0 = arith.constant 0 : i32
    %c0_i32_1 = arith.constant 0 : i32
    return %c0_i32, %arg0, %c0_i32_0 : i32, i32, i32
  }
}

</mosaic_0001>

<bundles_post_ra>
// kernel: policy_forward.1
= control target key start
LH: loop header
LB: loop body
LE: loop exit
PB: predicated region body
PF: predicated region fallthrough
CT: control target
= control target key end

     0   :  { %s727_s0 = inlined_call_operand.<no memory space> [shape: s32[1,1], index: 0, kind: input, shape index: {}]   ;;  %s728_s1 = inlined_call_operand.vmem [shape: f32[2,1,32], index: 1, kind: input, shape index: {}, may-alias: {1,7}]   ;;  %s729_s2 = inlined_call_operand.hbm [shape: f32[16,32], index: 2, kind: input, shape index: {}]   ;;  %s730_s3 = inlined_call_operand.hbm [shape: bf16[96,128], index: 3, kind: input, shape index: {}]   ;;  %s731_s4 = inlined_call_operand.vmem [shape: f32[2,128], index: 4, kind: input, shape index: {}]   ;;  %s732_s5 = inlined_call_operand.vmem [shape: f32[1,1,128], index: 5, kind: output, shape index: {0}]   ;;  %s733_s6 = inlined_call_operand.hbm [shape: s32[1,128], index: 6, kind: output, shape index: {1}]   ;;  %s734_s7 = inlined_call_operand.vmem [shape: f32[2,1,32], index: 7, kind: output, shape index: {2}, may-alias: {1,7}]  }
   0x1   :  { %v13_v0 = vstv %s727_s0 }
   0x2   :  { %14 = vst [vmem:[#allocation2] sm:$0x1] %v13_v0 }
   0x3   :  { %15 = vsyncpa [#allocation4], 0 }
   0x4   :  { %16 = vsyncpa [#allocation7], 0 }
   0x5   :  { %17 = vsyncpa [#allocation5], 0  ;;  %s584_s26 = smov [#allocation3]   ;;  %s512_s30 = scalar_lea.hbm %s729_s2, 256 }
   0x6   :  { %s27_s27 = sshll.u32 %s584_s26, 4  ;;  %p513_p0 = scmp.ne.s32.totalorder %s729_s2, %s512_s30  ;;  %s28_s27 = int_to_ptr.vmem [resolvable:$true] %s27_s27 }
   0x7   :  { %p516_p1 = scmp.lt.u32.totalorder %s512_s30, %s729_s2 }
   0x9   :  { %p518_p2 = pnand %p516_p1, %p513_p0 }
   0xb   :  { %521 = shalt.err (!%p518_p2)
}
   0xc   :  { %s522_s0 = scalar_lea.vmem %s28_s27, 256  ;;  %p527_p4 = scmp.lt.s32.totalorder %s28_s27, %s28_s27 }
   0xd   :  { %p523_p3 = scmp.ne.s32.totalorder %s28_s27, %s522_s0  ;;  %p528_p5 = scmp.lt.s32.totalorder %s522_s0, %s522_s0 }
   0xf   :  { %p529_p6 = por %p528_p5, %p527_p4 }
  0x11   :  { %p530_p7 = pnand %p529_p6, %p523_p3 }
  0x13   :  { %533 = shalt.err (!%p530_p7)
}
  0x14   :  { %s585_s12 = smov 128   ;;  %s586_s13 = smov 8  }
  0x15   :  { %33 = dma.hbm_to_vmem [thread:$0]  %s729_s2, 256, %s28_s27, [#allocation4], %s585_s12, %s585_s12, %s586_s13  }
  0x16   :  { %s587_s16 = smov [#allocation6]   ;;  %s534_s20 = scalar_lea.hbm %s730_s3, 768 }
  0x17   :  { %s39_s17 = sshll.u32 %s587_s16, 4  ;;  %p535_p8 = scmp.ne.s32.totalorder %s730_s3, %s534_s20  ;;  %s40_s17 = int_to_ptr.vmem [resolvable:$true] %s39_s17 }
  0x18   :  { %p538_p9 = scmp.lt.u32.totalorder %s534_s20, %s730_s3 }
  0x1a   :  { %p540_p10 = pnand %p538_p9, %p535_p8 }
  0x1c   :  { %543 = shalt.err (!%p540_p10)
}
  0x1d   :  { %s544_s25 = scalar_lea.vmem %s40_s17, 768  ;;  %p549_p12 = scmp.lt.s32.totalorder %s40_s17, %s40_s17 }
  0x1e   :  { %p545_p11 = scmp.ne.s32.totalorder %s40_s17, %s544_s25  ;;  %p550_p13 = scmp.lt.s32.totalorder %s544_s25, %s544_s25 }
  0x20   :  { %p551_p0 = por %p550_p13, %p549_p12 }
  0x22   :  { %p552_p1 = pnand %p551_p0, %p545_p11 }
  0x24   :  { %555 = shalt.err (!%p552_p1)
}
  0x25   :  { %s588_s2 = smov 64   ;;  %s589_s26 = smov 4  }
  0x26   :  { %45 = dma.hbm_to_vmem [thread:$0]  %s730_s3, 768, %s40_s17, [#allocation7], %s588_s2, %s588_s2, %s589_s26  }
  0x27   :  { %578 = dma.done.wait [#allocation4], 256  }
  0x28   :  { %579 = vsyncadd [#allocation4], 4294967040 }
  0x29   :  { %580 = dma.done.wait [#allocation7], 768  }
  0x2a   :  { %581 = vsyncadd [#allocation7], 4294966528  ;;  %v590_v1 = vmov 0   ;;  %v73_v2 = vld [vmem:[#allocation2] sm:$0x1]  ;;  %v71_v3 = vld [vmem:[#allocation3] sm:$0xff]  ;;  %v55_v10 = vlaneseq }
  0x2b   :  { %493 = vset.pattern.permute.xlu0 %v590_v1  ;;  %382 = vst [vmem:[#allocation8] sm:$0x1] %v590_v1  ;;  %v72_v4 = vld [vmem:[#allocation3 + $0x8] sm:$0xff]  ;;  %v591_v5 = vmov 0.0|0.0   ;;  %vm592_vm0 = vmmov 0   ;;  %v593_v7 = vmov 0.0  }
  0x2c   :  { %75 = vperm.xlu0 %493, %v73_v2   ;;  %477 = vmatprep.subr.bf16.mxu0 %v591_v5  ;;  %v478_v6 = vpack.c.bf16 %v72_v4, %v71_v3  ;;  %v494_v8 = vld [vmem:[#allocation6 + $0x10] sm:$0xff]   ;;  %v496_v9 = vld [vmem:[#allocation6 + $0x18] sm:$0xff]   ;;  %v78_v11 = vshrl.u32 %v55_v10, 7  ;;  %v56_v13 = vand.u32 127, %v55_v10  ;;  %vm84_vm1 = vcmask 130048   ;;  %v495_v16 = vld [vmem:[#allocation6] sm:$0xff]  }
  0x2d   :  { %450 = vmatprep.mubr.msk.f32.mxu0 %vm592_vm0, %v593_v7  ;;  %453 = vmatprep.subr.bf16.mxu1 %v593_v7  ;;  %v158_v18 = vld [vmem:[%s728_s1] sm:$0x1]  ;;  %vm176_vm3 = vcmask 261120   ;;  %v429_v21 = vld [vmem:[%s728_s1 + $0x1] ss:$0 sm:$0xff]  ;;  %s594_s9 = smov 32  }
  0x2e   :  { %479 = vmatpush3.bf16.msra.mxu0 %v478_v6  ;;  %457 = vmatprep.mubr.msk.bf16.mxu1 %vm592_vm0, %v593_v7  ;;  %v79_v12 = vsub.s32 0, %v78_v11  ;;  %v163_v19 = vpack.c.bf16 %v158_v18, %v158_v18  ;;  %v497_v20 = vld [vmem:[#allocation6 + $0x8] sm:$0xff]   ;;  %v498_v48 = vld [vmem:[#allocation6 + $0x20] sm:$0xff]   ;;  %v70_v55 = vld [vmem:[%s731_s4 + $0x1] sm:$0x1]  ;;  %vm367_vm4 = vcmask 1040384  }
  0x2f   :  { %461 = vmatprep.subr.bf16.mxu0 %v593_v7  ;;  %454 = vmatpush3.bf16.msra.mxu1 %v494_v8  ;;  %v69_v30 = vld [vmem:[%s731_s4] sm:$0x1]  ;;  %vm387_vm5 = vcmask 253952   ;;  %s595_s13 = smov 96   ;;  %s596_s14 = smov [#allocation8]  }
  0x30   :  { %455 = vmatprep.subr.bf16.mxu1 %v593_v7  ;;  %288 = vrot.lane.b32.xlu1 %v429_v21, %s594_s9  ;;  %v499_v49 = vld [vmem:[#allocation6 + $0x28] sm:$0xff]   ;;  %s403_s15 = sshll.u32 %s596_s14, 4  ;;  %s404_s15 = int_to_ptr.vmem [resolvable:$true] %s403_s15 }
  0x31   :  { %s556_s16 = scalar_lea.vmem %s404_s15, 16  ;;  %s560_s17 = scalar_lea.vmem %s404_s15, 32 }
  0x32   :  { %p557_p2 = scmp.ne.s32.totalorder %s404_s15, %s556_s16  ;;  %p561_p3 = scmp.lt.s32.totalorder %s404_s15, %s404_s15 }
  0x33   :  { %456 = vmatpush3.bf16.msra.mxu1 %v496_v9  ;;  %p562_p4 = scmp.lt.s32.totalorder %s560_s17, %s556_s16 }
  0x34   :  { %469 = vmatprep.subr.bf16.mxu1 %v593_v7 }
  0x35   :  { %p563_p5 = por %p562_p4, %p561_p3 }
  0x36   :  { %458 = vmatmul.mubr.msk.bf16.vlgmr.msra.gmra.mrb[0].mxu1 %vm176_vm3, %v163_v19 }
  0x37   :  { %473 = vmatprep.mubr.msk.bf16.mxu1 %vm592_vm0, %v593_v7  ;;  %470 = vmatpush3.bf16.msra.mxu1 %v498_v48  ;;  %p564_p6 = pnand %p563_p5, %p557_p2 }
  0x38   :  { %471 = vmatprep.subr.bf16.mxu1 %v593_v7 }
  0x3b   :  { %472 = vmatpush3.bf16.msra.mxu1 %v499_v49 }
  0xa2   :  { %v289_v44 = vpop.permute.xlu1 %288 }
  0xab   :  { %v76_v14 = vpop.permute.xlu0 %75 }
  0xac   :  { %v80_v15 = vrot.slane %v76_v14, %v79_v12 }
  0xae   :  { %vm81_vm2 = vcmp.eq.s32.totalorder %v56_v13, %v80_v15 }
  0xaf   :  { %v419_v17 = vsel %vm81_vm2, 1.0, %v593_v7 }
  0xb0   :  { %451 = vmatmul.mubr.msk.f32.vlgmr.msra.gmra.mrb[0].mxu0 %vm84_vm1, %v419_v17 }
  0xb1   :  { %462 = vmatpush3.bf16.msra.mxu0 %v495_v16  ;;  %465 = vmatprep.mubr.msk.bf16.mxu0 %vm592_vm0, %v593_v7 }
  0xb2   :  { %463 = vmatprep.subr.bf16.mxu0 %v593_v7 }
  0xb5   :  { %464 = vmatpush3.bf16.msra.mxu0 %v497_v20 }
 0x109   :  { %v214_v26 = vpop.f32.mrb[0].mxu1 }
 0x10a   :  { %v459_v27 = vpop.f32.mrb[1].mxu1 }
 0x10b   :  { %v217_v28 = vpop.f32.mrb[2].mxu1 }
 0x10c   :  { %v460_v29 = vpop.f32.mrb[3].mxu1 }
 0x183   :  { %v154_v22 = vpop.f32.mrb[0].mxu0 }
 0x184   :  { %v161_v23 = vmax.f32 %v154_v22, 0.0  ;;  %v452_v24 = vpop.f32.mrb[1].mxu0 }
 0x186   :  { %v162_v25 = vpack.c.bf16 %v161_v23, %v161_v23 }
 0x188   :  { %466 = vmatmul.mubr.msk.bf16.vlgmr.msra.gmra.mrb[4].mxu0 %vm176_vm3, %v162_v25 }
 0x25b   :  { %v269_v31 = vpop.f32.mrb[4].mxu0 }
 0x25c   :  { %v270_v32 = vadd.f32 %v269_v31, %v214_v26  ;;  %v467_v33 = vpop.f32.mrb[5].mxu0 }
 0x25d   :  { %v272_v34 = vpop.f32.mrb[6].mxu0 }
 0x25e   :  { %v275_v35 = vadd.f32 %v270_v32, %v69_v30  ;;  %v468_v36 = vpop.f32.mrb[7].mxu0 }
 0x260   :  { %500 = vtanh.f32 %v275_v35  ;;  %v428_v38 = vmul.f32 -1.442695, %v275_v35 }
 0x262   :  { %502 = vpow2.f32 %v428_v38 }
 0x26a   :  { %v501_v37 = vpop.eup %500 }
 0x26b   :  { %293 = vrot.lane.b32.xlu0 %v501_v37, %s588_s2 }
 0x26c   :  { %v503_v39 = vpop.eup %502 }
 0x26d   :  { %v279_v40 = vadd.f32 1.0, %v503_v39 }
 0x26f   :  { %504 = vrcp.f32 %v279_v40 }
 0x279   :  { %v505_v41 = vpop.eup %504 }
 0x27a   :  { %v291_v45 = vmul.f32 %v505_v41, %v289_v44 }
 0x2dd   :  { %v294_v42 = vpop.permute.xlu0 %293 }
 0x2de   :  { %v296_v43 = vmul.f32 %v505_v41, %v294_v42 }
 0x2e0   :  { %298 = vrot.lane.b32.xlu1 %v296_v43, %s594_s9 }
 0x352   :  { %v299_v46 = vpop.permute.xlu1 %298 }
 0x353   :  { %v301_v47 = vadd.f32 %v299_v46, %v291_v45 }
 0x355   :  { %506 = vtanh.f32 %v301_v47 }
 0x35f   :  { %v507_v50 = vpop.eup %506 }
 0x360   :  { %304 = vrot.lane.b32.xlu0 %v507_v50, %s588_s2 }
 0x3d2   :  { %v305_v51 = vpop.permute.xlu0 %304 }
 0x3d3   :  { %v307_v52 = vmul.f32 %v505_v41, %v305_v51 }
 0x3d5   :  { %v308_v53 = vpack.c.bf16 %v307_v52, %v307_v52 }
 0x3d7   :  { %310 = vrot.lane.b32.xlu1 %v308_v53, %s594_s9 }
 0x449   :  { %v311_v54 = vpop.permute.xlu1 %310 }
 0x44a   :  { %474 = vmatmul.mubr.msk.bf16.vlgmr.msra.gmra.mrb[4].mxu1 %vm176_vm3, %v311_v54 }
 0x51d   :  { %v361_v56 = vpop.f32.mrb[4].mxu1 }
 0x51e   :  { %v362_v57 = vadd.f32 %v361_v56, %v70_v55  ;;  %v475_v58 = vpop.f32.mrb[5].mxu1 }
 0x51f   :  { %v364_v59 = vpop.f32.mrb[6].mxu1 }
 0x520   :  { %v476_v60 = vpop.f32.mrb[7].mxu1  ;;  %v368_v61 = vsel %vm367_vm4, %v362_v57, -inf }
 0x521   :  { %369 = vmax.xlane.f32.xlu0 %v368_v61 }
 0x537   :  { %384 = vrot.lane.b32.xlu0 %v307_v52, %s594_s9 }
 0x5ae   :  { %v370_v62 = vpop.xlane.xlu0 %369 }
 0x5af   :  { %v371_v63 = vsub.f32 %v362_v57, %v370_v62 }
 0x5b1   :  { %v372_v0 = vmul.f32 1.442695, %v371_v63 }
 0x5b2   :  { %v385_v1 = vpop.permute.xlu0 %384 }
 0x5b3   :  { %508 = vpow2.f32 %v372_v0  ;;  %388 = vst.msk [vmem:[%s734_s7] sm:$0x1] %vm387_vm5, %v385_v1 }
 0x5bd   :  { %v509_v2 = vpop.eup %508 }
 0x5be   :  { %v374_v3 = vsel %vm367_vm4, %v509_v2, 0.0 }
 0x5bf   :  { %375 = vadd.xlane.f32.xlu1 %v374_v3 }
 0x5d0   :  { %390 = vrot.lane.b32.xlu1 %v301_v47, %s595_s13 }
 0x5d1   :  { %567 = shalt.err (!%p564_p6)
}
 0x5d2   :  { %s568_s20 = scalar_lea.hbm %s733_s6, 16 }
 0x5d3   :  { %p569_p7 = scmp.ne.s32.totalorder %s733_s6, %s568_s20  ;;  %p572_p8 = scmp.lt.u32.totalorder %s568_s20, %s733_s6 }
 0x5d5   :  { %p574_p9 = pnand %p572_p8, %p569_p7 }
 0x5d7   :  { %577 = shalt.err (!%p574_p9)
}
 0x5d8   :  { %406 = dma.vmem_to_hbm [thread:$0]  %s404_s15, 16, %s733_s6, [#allocation5]  }
 0x64c   :  { %v376_v4 = vpop.xlane.xlu1 %375 }
 0x64d   :  { %510 = vlog2.f32 %v376_v4 }
 0x650   :  { %v391_v5 = vpop.permute.xlu1 %390 }
 0x651   :  { %433 = vst.msk [vmem:[%s734_s7 + $0x1] sm:$0x1] %vm387_vm5, %v391_v5 }
 0x657   :  { %v511_v6 = vpop.eup %510 }
 0x658   :  { %v378_v7 = vmul.f32 0.6931472, %v511_v6 }
 0x65a   :  { %v379_v8 = vadd.f32 %v378_v7, %v370_v62 }
 0x65c   :  { %v380_v9 = vsub.f32 %v362_v57, %v379_v8 }
 0x65e   :  { %381 = vst [vmem:[%s732_s5] sm:$0x1] %v380_v9 }
 0x65f   :  { %582 = dma.done.wait [#allocation5], 16  }
 0x660   :  { %583 = vsyncadd [#allocation5], 4294967280 }
 0x661   :  { %416 = vsyncpa [#allocation4], 1 }
 0x662   :  { %417 = vsyncpa [#allocation7], 1 }
 0x663   :  { %418 = vsyncpa [#allocation5], 1 }

</bundles_post_ra>
